<compile_context>
chip_gen: v7x
topology: tpu7x:2x2x1
jax: 0.10.0
libtpu: 0.0.40
codegen_flags: <defaults>
</compile_context>

<pallas_src>
import functools

import jax
import jax.numpy as jnp
from jax.experimental import pallas as pl
from jax.experimental.pallas import tpu as pltpu

LOG_STD_MAX = 2.0
LOG_STD_MIN = -5.0
# log_std = _LS_A + _LS_B * tanh(z)
_LS_A = LOG_STD_MIN + 0.5 * (LOG_STD_MAX - LOG_STD_MIN)   # -1.5
_LS_B = 0.5 * (LOG_STD_MAX - LOG_STD_MIN)                 # 3.5


def _round_up(v, m):
    return ((v + m - 1) // m) * m


def actor_kernel(x_ref, w1_ref, b1_ref, w2_ref, b2_ref, wh_ref, bh_ref,
                 out_ref, *, act_dim, ew_dtype):
    """One batch tile of the SAC MLPActor forward ('full' encoder).

    MXU operands are bf16 with f32 accumulation; elementwise work runs in
    `ew_dtype` (bf16 on v6e/v7x, f32 on v5e).  The fused head produces a
    single lane-dense [tile_b, 128] slab: mean in lanes [0, act_dim),
    squashed log_std in [act_dim, 2*act_dim), zeros elsewhere.
    """
    ew = ew_dtype
    bf16 = jnp.bfloat16

    xb = x_ref[...].astype(bf16)
    h1 = jnp.dot(xb, w1_ref[...], preferred_element_type=jnp.float32)
    h1 = jnp.maximum(h1.astype(ew) + b1_ref[...].astype(ew), 0).astype(bf16)

    h2 = jnp.dot(h1, w2_ref[...], preferred_element_type=jnp.float32)
    h = jnp.maximum(h2.astype(ew) + b2_ref[...].astype(ew), 0).astype(bf16)

    # Fused, lane-dense head: one MXU push with N = 128 (full column tile).
    z = jnp.dot(h, wh_ref[...], preferred_element_type=jnp.float32)
    z = z.astype(ew) + bh_ref[...].astype(ew)

    # tanh runs on the EUP (separate bundle slot) so squashing all lanes is
    # ~free; select mean vs. squashed log_std lanes with a per-lane mask
    # (no in-kernel slice/concat) and do ONE lane-dense store of the slab.
    squashed = _LS_A + _LS_B * jnp.tanh(z)
    lane = jax.lax.broadcasted_iota(jnp.int32, z.shape, dimension=1)
    out_ref[...] = jnp.where(lane < act_dim, z, squashed).astype(out_ref.dtype)


def _tpu_generation():
    try:
        kind = jax.devices()[0].device_kind.lower()
    except Exception:
        return None
    for tag in ("v7", "v6", "v5"):
        if tag in kind:
            return tag
    return None


def _pick_tiling():
    """(elementwise dtype, max batch tile) per TPU generation."""
    gen = _tpu_generation()
    if gen == "v5":
        # No bf16 VPU/EUP; keep f32 [tile,256] intermediates at ~half the
        # vreg file by capping the tile at 128 rows.
        return jnp.float32, 128
    if gen == "v7":
        # bf16 elementwise; tile chosen so typical B>=512 yields an even
        # grid >= 2 for the megacore-parallel batch axis (2 TCs/chip).
        return jnp.bfloat16, 256
    if gen == "v6":
        return jnp.bfloat16, 512
    return jnp.float32, 256   # unknown backend: conservative defaults


def mlp_actor_forward(x, params, *, max_tile_b=None, ew_dtype=None,
                      single_buffer_weights=True):
    """x: [B, obs_dim] float32. params: dict from init_params (bf16 matmul
    weights, f32 biases, lane-padded fused mean|log_std head, act_dim int).
    Returns (mean [B, act_dim], log_std [B, act_dim]) in f32."""
    w1, b1 = params["w1"], params["b1"]
    w2, b2 = params["w2"], params["b2"]
    wh, bh = params["wh"], params["bh"]
    act_dim = params["act_dim"]

    auto_ew, auto_tile = _pick_tiling()
    if ew_dtype is None:
        ew_dtype = auto_ew
    if max_tile_b is None:
        max_tile_b = auto_tile

    B, obs_dim = x.shape
    obs_pad = w1.shape[0]
    if obs_dim != obs_pad:          # lane-dense K for the first matmul
        x = jnp.pad(x, ((0, 0), (0, obs_pad - obs_dim)))

    # Split the batch into `grid` near-equal, 8-row-aligned tiles so padding
    # waste is < 8 rows (instead of up to tile_b-1 when rounding to tile_b).
    grid = max(1, pl.cdiv(B, max_tile_b))
    tile_b = _round_up(pl.cdiv(B, grid), 8)
    b_pad = grid * tile_b
    if b_pad != B:
        x = jnp.pad(x, ((0, b_pad - B), (0, 0)))

    head_pad = wh.shape[1]          # lane-dense output slab width (>= 128)

    kernel = functools.partial(actor_kernel, act_dim=act_dim,
                               ew_dtype=ew_dtype)

    def build(single_buffer):
        if single_buffer:
            # Weights/biases never change across the batch grid; a single
            # buffer avoids dead double-buffer VMEM + descriptor bookkeeping.
            def resident(a):
                return pl.BlockSpec(a.shape, lambda i: (0, 0),
                                    pipeline_mode=pl.Buffered(1))
        else:
            def resident(a):
                return pl.BlockSpec(a.shape, lambda i: (0, 0))
        return pl.pallas_call(
            kernel,
            out_shape=jax.ShapeDtypeStruct((b_pad, head_pad), jnp.float32),
            grid=(grid,),
            in_specs=[
                pl.BlockSpec((tile_b, obs_pad), lambda i: (i, 0)),
                resident(w1), resident(b1),
                resident(w2), resident(b2),
                resident(wh), resident(bh),
            ],
            out_specs=pl.BlockSpec((tile_b, head_pad), lambda i: (i, 0)),
            compiler_params=pltpu.CompilerParams(
                dimension_semantics=("parallel",)),
        )

    args = (x, w1, b1, w2, b2, wh, bh)
    if single_buffer_weights:
        try:
            out = build(True)(*args)
        except Exception:
            # Fallback if single-buffered pipeline_mode is unsupported.
            out = build(False)(*args)
    else:
        out = build(False)(*args)

    mean = out[:B, :act_dim]
    log_std = out[:B, act_dim:2 * act_dim]
    return mean, log_std


def init_params(key, obs_dim, act_dim, hidden=256):
    """Deterministic synthetic init (PyTorch-Linear-like uniform ranges).
    Matmul weights stored bf16, biases f32.  The mean/log_std heads are fused
    and zero-padded to a lane-dense >=128-wide slab; w1 is row-padded so the
    first matmul's K is a multiple of 128."""
    ks = jax.random.split(key, 8)

    def lin(kw, kb, fan_in, fan_out):
        bound = 1.0 / jnp.sqrt(fan_in)
        w = jax.random.uniform(kw, (fan_in, fan_out), jnp.float32, -bound, bound)
        b = jax.random.uniform(kb, (1, fan_out), jnp.float32, -bound, bound)
        return w, b

    w1, b1 = lin(ks[0], ks[1], obs_dim, hidden)
    w2, b2 = lin(ks[2], ks[3], hidden, hidden)
    wm, bm = lin(ks[4], ks[5], hidden, act_dim)
    ws, bs = lin(ks[6], ks[7], hidden, act_dim)

    # Lane-dense K for the first matmul: zero-pad obs_dim rows up to 128k.
    obs_pad = _round_up(obs_dim, 128)
    w1p = jnp.zeros((obs_pad, hidden), jnp.float32).at[:obs_dim].set(w1)

    # Lane-dense fused head: [mean | log_std | zeros], width >= 128.
    head_pad = _round_up(max(2 * act_dim, 128), 128)
    wh = jnp.zeros((hidden, head_pad), jnp.float32)
    wh = wh.at[:, :act_dim].set(wm).at[:, act_dim:2 * act_dim].set(ws)
    bh = jnp.zeros((1, head_pad), jnp.float32)
    bh = bh.at[:, :act_dim].set(bm).at[:, act_dim:2 * act_dim].set(bs)

    # TODO(synk): on v7x the MXU also takes fp8 (e4m3) operands; storing w1/w2
    # as fp8 would halve weight DMA bytes but needs policy-accuracy validation.
    return dict(
        w1=w1p.astype(jnp.bfloat16), b1=b1,
        w2=w2.astype(jnp.bfloat16), b2=b2,
        wh=wh.astype(jnp.bfloat16), bh=bh,
        act_dim=act_dim,
    )


def reference_forward(x, p):
    """Pure-JAX reference matching the PyTorch forward with the kernel's MXU
    quantization (bf16 operands, f32 accumulation); elementwise in f32.
    (v6e/v7x kernels do bf16 elementwise -> difference well under 1e-2.)"""
    f32, bf16 = jnp.float32, jnp.bfloat16
    act_dim = p["act_dim"]
    obs_pad = p["w1"].shape[0]
    x = x.astype(f32)
    if x.shape[1] != obs_pad:
        x = jnp.pad(x, ((0, 0), (0, obs_pad - x.shape[1])))
    h1 = jnp.maximum(
        jnp.dot(x.astype(bf16), p["w1"], preferred_element_type=f32) + p["b1"],
        0.0)
    h = jnp.maximum(
        jnp.dot(h1.astype(bf16), p["w2"], preferred_element_type=f32) + p["b2"],
        0.0)
    z = jnp.dot(h.astype(bf16), p["wh"], preferred_element_type=f32) + p["bh"]
    mean = z[:, :act_dim]
    log_std = _LS_A + _LS_B * jnp.tanh(z[:, act_dim:2 * act_dim])
    return mean, log_std


if __name__ == "__main__":
    key = jax.random.PRNGKey(0)
    k_x, k_p = jax.random.split(key)

    batch = 8
    obs_dim = 16     # np.prod(env.single_observation_space.shape)
    act_dim = 8      # np.prod(env.single_action_space.shape)
    hidden = 256     # 'full' encoder width

    x = jax.random.normal(k_x, (batch, obs_dim), dtype=jnp.float32)
    params = init_params(k_p, obs_dim, act_dim, hidden)

    mean, log_std = mlp_actor_forward(x, params)
    jax.block_until_ready((mean, log_std))

    # sanity-check against pure-JAX reference (bf16 operands -> loose tol)
    mean_ref, log_std_ref = reference_forward(x, params)
    assert mean.shape == (batch, act_dim) and log_std.shape == (batch, act_dim)
    assert jnp.allclose(mean, mean_ref, atol=3e-2, rtol=3e-2)
    assert jnp.allclose(log_std, log_std_ref, atol=3e-2, rtol=3e-2)
    assert bool(jnp.all(log_std >= LOG_STD_MIN)) and bool(jnp.all(log_std <= LOG_STD_MAX))

    # TODO(synk): get_action's randn sampling / tanh-squashed log_prob path is
    # host-side policy logic (uses torch.randn_like + registered buffers), not
    # part of forward(); not implemented in-kernel.

    print("KERNEL_OK")
</pallas_src>

<mosaic_0001>
module attributes {stable_mosaic.version = 11 : i64} {
  func.func @actor_kernel(%arg0: i32, %arg1: memref<8x128xf32, #tpu.memory_space<vmem>>, %arg2: memref<128x256xbf16, #tpu.memory_space<vmem>>, %arg3: memref<1x256xf32, #tpu.memory_space<vmem>>, %arg4: memref<256x256xbf16, #tpu.memory_space<vmem>>, %arg5: memref<1x256xf32, #tpu.memory_space<vmem>>, %arg6: memref<256x128xbf16, #tpu.memory_space<vmem>>, %arg7: memref<1x128xf32, #tpu.memory_space<vmem>>, %arg8: memref<8x128xf32, #tpu.memory_space<vmem>>) attributes {dimension_semantics = [#tpu.dimension_semantics<parallel>], iteration_bounds = array<i64: 1>, scalar_prefetch = 0 : i64, scratch_operands = 0 : i64, tpu.core_type = #tpu.core_type<tc>, window_params = [{transform_indices = @transform_0, window_bounds = array<i64: 8, 128>}, {pipeline_mode = #tpu.pipeline_mode<synchronous>, transform_indices = @transform_1, window_bounds = array<i64: 128, 256>}, {pipeline_mode = #tpu.pipeline_mode<synchronous>, transform_indices = @transform_2, window_bounds = array<i64: 1, 256>}, {pipeline_mode = #tpu.pipeline_mode<synchronous>, transform_indices = @transform_3, window_bounds = array<i64: 256, 256>}, {pipeline_mode = #tpu.pipeline_mode<synchronous>, transform_indices = @transform_4, window_bounds = array<i64: 1, 256>}, {pipeline_mode = #tpu.pipeline_mode<synchronous>, transform_indices = @transform_5, window_bounds = array<i64: 256, 128>}, {pipeline_mode = #tpu.pipeline_mode<synchronous>, transform_indices = @transform_6, window_bounds = array<i64: 1, 128>}, {transform_indices = @transform_7, window_bounds = array<i64: 8, 128>}]} {
    %c0 = arith.constant 0 : index
    %c0_0 = arith.constant 0 : index
    %0 = vector.load %arg1[%c0, %c0_0] : memref<8x128xf32, #tpu.memory_space<vmem>>, vector<8x128xf32>
    %1 = arith.truncf %0 : vector<8x128xf32> to vector<8x128xbf16>
    %c0_1 = arith.constant 0 : index
    %c0_2 = arith.constant 0 : index
    %2 = vector.load %arg2[%c0_1, %c0_2] : memref<128x256xbf16, #tpu.memory_space<vmem>>, vector<128x256xbf16>
    %cst = arith.constant dense<0.000000e+00> : vector<8x256xf32>
    %3 = tpu.matmul %1, %2, %cst {dimension_numbers = #tpu.dot_dimension_numbers<[1], [0], [0], [1], [0, 0, 1, 1], [], []>} : vector<8x128xbf16>, vector<128x256xbf16>, vector<8x256xf32> -> vector<8x256xf32>
    %c0_3 = arith.constant 0 : index
    %c0_4 = arith.constant 0 : index
    %4 = vector.load %arg3[%c0_3, %c0_4] : memref<1x256xf32, #tpu.memory_space<vmem>>, vector<1x256xf32>
    %5 = vector.broadcast %4 : vector<1x256xf32> to vector<8x256xf32>
    %6 = arith.addf %3, %5 : vector<8x256xf32>
    %cst_5 = arith.constant 0.000000e+00 : f32
    %7 = vector.broadcast %cst_5 : f32 to vector<8x256xf32>
    %8 = arith.maximumf %6, %7 : vector<8x256xf32>
    %9 = arith.truncf %8 : vector<8x256xf32> to vector<8x256xbf16>
    %c0_6 = arith.constant 0 : index
    %c0_7 = arith.constant 0 : index
    %10 = vector.load %arg4[%c0_6, %c0_7] : memref<256x256xbf16, #tpu.memory_space<vmem>>, vector<256x256xbf16>
    %cst_8 = arith.constant dense<0.000000e+00> : vector<8x256xf32>
    %11 = tpu.matmul %9, %10, %cst_8 {dimension_numbers = #tpu.dot_dimension_numbers<[1], [0], [0], [1], [0, 0, 1, 1], [], []>} : vector<8x256xbf16>, vector<256x256xbf16>, vector<8x256xf32> -> vector<8x256xf32>
    %c0_9 = arith.constant 0 : index
    %c0_10 = arith.constant 0 : index
    %12 = vector.load %arg5[%c0_9, %c0_10] : memref<1x256xf32, #tpu.memory_space<vmem>>, vector<1x256xf32>
    %13 = vector.broadcast %12 : vector<1x256xf32> to vector<8x256xf32>
    %14 = arith.addf %11, %13 : vector<8x256xf32>
    %cst_11 = arith.constant 0.000000e+00 : f32
    %15 = vector.broadcast %cst_11 : f32 to vector<8x256xf32>
    %16 = arith.maximumf %14, %15 : vector<8x256xf32>
    %17 = arith.truncf %16 : vector<8x256xf32> to vector<8x256xbf16>
    %c0_12 = arith.constant 0 : index
    %c0_13 = arith.constant 0 : index
    %18 = vector.load %arg6[%c0_12, %c0_13] : memref<256x128xbf16, #tpu.memory_space<vmem>>, vector<256x128xbf16>
    %cst_14 = arith.constant dense<0.000000e+00> : vector<8x128xf32>
    %19 = tpu.matmul %17, %18, %cst_14 {dimension_numbers = #tpu.dot_dimension_numbers<[1], [0], [0], [1], [0, 0, 1, 1], [], []>} : vector<8x256xbf16>, vector<256x128xbf16>, vector<8x128xf32> -> vector<8x128xf32>
    %c0_15 = arith.constant 0 : index
    %c0_16 = arith.constant 0 : index
    %20 = vector.load %arg7[%c0_15, %c0_16] : memref<1x128xf32, #tpu.memory_space<vmem>>, vector<1x128xf32>
    %21 = vector.broadcast %20 : vector<1x128xf32> to vector<8x128xf32>
    %22 = arith.addf %19, %21 : vector<8x128xf32>
    %23 = math.tanh %22 : vector<8x128xf32>
    %cst_17 = arith.constant 3.500000e+00 : f32
    %24 = vector.broadcast %cst_17 : f32 to vector<8x128xf32>
    %25 = arith.mulf %24, %23 : vector<8x128xf32>
    %cst_18 = arith.constant -1.500000e+00 : f32
    %26 = vector.broadcast %cst_18 : f32 to vector<8x128xf32>
    %27 = arith.addf %26, %25 : vector<8x128xf32>
    %28 = tpu.iota {dimensions = array<i32: 1>} : vector<8x128xi32>
    %c8_i32 = arith.constant 8 : i32
    %29 = vector.broadcast %c8_i32 : i32 to vector<8x128xi32>
    %30 = arith.cmpi slt, %28, %29 : vector<8x128xi32>
    %31 = arith.select %30, %22, %27 : vector<8x128xi1>, vector<8x128xf32>
    %c0_19 = arith.constant 0 : index
    %c0_20 = arith.constant 0 : index
    %32 = vector.load %arg8[%c0_19, %c0_20] : memref<8x128xf32, #tpu.memory_space<vmem>>, vector<8x128xf32>
    tpu.vector_store %arg8[%c0_19, %c0_20], %31 {strides = array<i32>} : memref<8x128xf32, #tpu.memory_space<vmem>>, vector<8x128xf32>,
    return
  }
  func.func @transform_0(%arg0: i32) -> (i32, i32) {
    %c0_i32 = arith.constant 0 : i32
    %c0_i32_0 = arith.constant 0 : i32
    return %arg0, %c0_i32 : i32, i32
  }
  func.func @transform_1(%arg0: i32) -> (i32, i32) {
    %c0_i32 = arith.constant 0 : i32
    %c0_i32_0 = arith.constant 0 : i32
    %c0_i32_1 = arith.constant 0 : i32
    return %c0_i32, %c0_i32_0 : i32, i32
  }
  func.func @transform_2(%arg0: i32) -> (i32, i32) {
    %c0_i32 = arith.constant 0 : i32
    %c0_i32_0 = arith.constant 0 : i32
    %c0_i32_1 = arith.constant 0 : i32
    return %c0_i32, %c0_i32_0 : i32, i32
  }
  func.func @transform_3(%arg0: i32) -> (i32, i32) {
    %c0_i32 = arith.constant 0 : i32
    %c0_i32_0 = arith.constant 0 : i32
    %c0_i32_1 = arith.constant 0 : i32
    return %c0_i32, %c0_i32_0 : i32, i32
  }
  func.func @transform_4(%arg0: i32) -> (i32, i32) {
    %c0_i32 = arith.constant 0 : i32
    %c0_i32_0 = arith.constant 0 : i32
    %c0_i32_1 = arith.constant 0 : i32
    return %c0_i32, %c0_i32_0 : i32, i32
  }
  func.func @transform_5(%arg0: i32) -> (i32, i32) {
    %c0_i32 = arith.constant 0 : i32
    %c0_i32_0 = arith.constant 0 : i32
    %c0_i32_1 = arith.constant 0 : i32
    return %c0_i32, %c0_i32_0 : i32, i32
  }
  func.func @transform_6(%arg0: i32) -> (i32, i32) {
    %c0_i32 = arith.constant 0 : i32
    %c0_i32_0 = arith.constant 0 : i32
    %c0_i32_1 = arith.constant 0 : i32
    return %c0_i32, %c0_i32_0 : i32, i32
  }
  func.func @transform_7(%arg0: i32) -> (i32, i32) {
    %c0_i32 = arith.constant 0 : i32
    %c0_i32_0 = arith.constant 0 : i32
    return %arg0, %c0_i32 : i32, i32
  }
}

module attributes {stable_mosaic.version = 11 : i64} {
  func.func @actor_kernel(%arg0: i32, %arg1: memref<8x128xf32, #tpu.memory_space<vmem>>, %arg2: memref<128x256xbf16, #tpu.memory_space<vmem>>, %arg3: memref<1x256xf32, #tpu.memory_space<vmem>>, %arg4: memref<256x256xbf16, #tpu.memory_space<vmem>>, %arg5: memref<1x256xf32, #tpu.memory_space<vmem>>, %arg6: memref<256x128xbf16, #tpu.memory_space<vmem>>, %arg7: memref<1x128xf32, #tpu.memory_space<vmem>>, %arg8: memref<8x128xf32, #tpu.memory_space<vmem>>) attributes {dimension_semantics = [#tpu.dimension_semantics<parallel>], iteration_bounds = array<i64: 1>, scalar_prefetch = 0 : i64, scratch_operands = 0 : i64, tpu.core_type = #tpu.core_type<tc>, window_params = [{transform_indices = @transform_0, window_bounds = array<i64: 8, 128>}, {pipeline_mode = #tpu.pipeline_mode<synchronous>, transform_indices = @transform_1, window_bounds = array<i64: 128, 256>}, {pipeline_mode = #tpu.pipeline_mode<synchronous>, transform_indices = @transform_2, window_bounds = array<i64: 1, 256>}, {pipeline_mode = #tpu.pipeline_mode<synchronous>, transform_indices = @transform_3, window_bounds = array<i64: 256, 256>}, {pipeline_mode = #tpu.pipeline_mode<synchronous>, transform_indices = @transform_4, window_bounds = array<i64: 1, 256>}, {pipeline_mode = #tpu.pipeline_mode<synchronous>, transform_indices = @transform_5, window_bounds = array<i64: 256, 128>}, {pipeline_mode = #tpu.pipeline_mode<synchronous>, transform_indices = @transform_6, window_bounds = array<i64: 1, 128>}, {transform_indices = @transform_7, window_bounds = array<i64: 8, 128>}]} {
    %c0 = arith.constant 0 : index
    %c0_0 = arith.constant 0 : index
    %0 = vector.load %arg1[%c0, %c0_0] : memref<8x128xf32, #tpu.memory_space<vmem>>, vector<8x128xf32>
    %1 = arith.truncf %0 : vector<8x128xf32> to vector<8x128xbf16>
    %c0_1 = arith.constant 0 : index
    %c0_2 = arith.constant 0 : index
    %2 = vector.load %arg2[%c0_1, %c0_2] : memref<128x256xbf16, #tpu.memory_space<vmem>>, vector<128x256xbf16>
    %cst = arith.constant dense<0.000000e+00> : vector<8x256xf32>
    %3 = tpu.matmul %1, %2, %cst {dimension_numbers = #tpu.dot_dimension_numbers<[1], [0], [0], [1], [0, 0, 1, 1], [], []>} : vector<8x128xbf16>, vector<128x256xbf16>, vector<8x256xf32> -> vector<8x256xf32>
    %c0_3 = arith.constant 0 : index
    %c0_4 = arith.constant 0 : index
    %4 = vector.load %arg3[%c0_3, %c0_4] : memref<1x256xf32, #tpu.memory_space<vmem>>, vector<1x256xf32>
    %5 = vector.broadcast %4 : vector<1x256xf32> to vector<8x256xf32>
    %6 = arith.addf %3, %5 : vector<8x256xf32>
    %cst_5 = arith.constant 0.000000e+00 : f32
    %7 = vector.broadcast %cst_5 : f32 to vector<8x256xf32>
    %8 = arith.maximumf %6, %7 : vector<8x256xf32>
    %9 = arith.truncf %8 : vector<8x256xf32> to vector<8x256xbf16>
    %c0_6 = arith.constant 0 : index
    %c0_7 = arith.constant 0 : index
    %10 = vector.load %arg4[%c0_6, %c0_7] : memref<256x256xbf16, #tpu.memory_space<vmem>>, vector<256x256xbf16>
    %cst_8 = arith.constant dense<0.000000e+00> : vector<8x256xf32>
    %11 = tpu.matmul %9, %10, %cst_8 {dimension_numbers = #tpu.dot_dimension_numbers<[1], [0], [0], [1], [0, 0, 1, 1], [], []>} : vector<8x256xbf16>, vector<256x256xbf16>, vector<8x256xf32> -> vector<8x256xf32>
    %c0_9 = arith.constant 0 : index
    %c0_10 = arith.constant 0 : index
    %12 = vector.load %arg5[%c0_9, %c0_10] : memref<1x256xf32, #tpu.memory_space<vmem>>, vector<1x256xf32>
    %13 = vector.broadcast %12 : vector<1x256xf32> to vector<8x256xf32>
    %14 = arith.addf %11, %13 : vector<8x256xf32>
    %cst_11 = arith.constant 0.000000e+00 : f32
    %15 = vector.broadcast %cst_11 : f32 to vector<8x256xf32>
    %16 = arith.maximumf %14, %15 : vector<8x256xf32>
    %17 = arith.truncf %16 : vector<8x256xf32> to vector<8x256xbf16>
    %c0_12 = arith.constant 0 : index
    %c0_13 = arith.constant 0 : index
    %18 = vector.load %arg6[%c0_12, %c0_13] : memref<256x128xbf16, #tpu.memory_space<vmem>>, vector<256x128xbf16>
    %cst_14 = arith.constant dense<0.000000e+00> : vector<8x128xf32>
    %19 = tpu.matmul %17, %18, %cst_14 {dimension_numbers = #tpu.dot_dimension_numbers<[1], [0], [0], [1], [0, 0, 1, 1], [], []>} : vector<8x256xbf16>, vector<256x128xbf16>, vector<8x128xf32> -> vector<8x128xf32>
    %c0_15 = arith.constant 0 : index
    %c0_16 = arith.constant 0 : index
    %20 = vector.load %arg7[%c0_15, %c0_16] : memref<1x128xf32, #tpu.memory_space<vmem>>, vector<1x128xf32>
    %21 = vector.broadcast %20 : vector<1x128xf32> to vector<8x128xf32>
    %22 = arith.addf %19, %21 : vector<8x128xf32>
    %23 = math.tanh %22 : vector<8x128xf32>
    %cst_17 = arith.constant 3.500000e+00 : f32
    %24 = vector.broadcast %cst_17 : f32 to vector<8x128xf32>
    %25 = arith.mulf %24, %23 : vector<8x128xf32>
    %cst_18 = arith.constant -1.500000e+00 : f32
    %26 = vector.broadcast %cst_18 : f32 to vector<8x128xf32>
    %27 = arith.addf %26, %25 : vector<8x128xf32>
    %28 = tpu.iota {dimensions = array<i32: 1>} : vector<8x128xi32>
    %c8_i32 = arith.constant 8 : i32
    %29 = vector.broadcast %c8_i32 : i32 to vector<8x128xi32>
    %30 = arith.cmpi slt, %28, %29 : vector<8x128xi32>
    %31 = arith.select %30, %22, %27 : vector<8x128xi1>, vector<8x128xf32>
    %c0_19 = arith.constant 0 : index
    %c0_20 = arith.constant 0 : index
    %32 = vector.load %arg8[%c0_19, %c0_20] : memref<8x128xf32, #tpu.memory_space<vmem>>, vector<8x128xf32>
    tpu.vector_store %arg8[%c0_19, %c0_20], %31 {strides = array<i32>} : memref<8x128xf32, #tpu.memory_space<vmem>>, vector<8x128xf32>,
    return
  }
  func.func @transform_0(%arg0: i32) -> (i32, i32) {
    %c0_i32 = arith.constant 0 : i32
    %c0_i32_0 = arith.constant 0 : i32
    return %arg0, %c0_i32 : i32, i32
  }
  func.func @transform_1(%arg0: i32) -> (i32, i32) {
    %c0_i32 = arith.constant 0 : i32
    %c0_i32_0 = arith.constant 0 : i32
    %c0_i32_1 = arith.constant 0 : i32
    return %c0_i32, %c0_i32_0 : i32, i32
  }
  func.func @transform_2(%arg0: i32) -> (i32, i32) {
    %c0_i32 = arith.constant 0 : i32
    %c0_i32_0 = arith.constant 0 : i32
    %c0_i32_1 = arith.constant 0 : i32
    return %c0_i32, %c0_i32_0 : i32, i32
  }
  func.func @transform_3(%arg0: i32) -> (i32, i32) {
    %c0_i32 = arith.constant 0 : i32
    %c0_i32_0 = arith.constant 0 : i32
    %c0_i32_1 = arith.constant 0 : i32
    return %c0_i32, %c0_i32_0 : i32, i32
  }
  func.func @transform_4(%arg0: i32) -> (i32, i32) {
    %c0_i32 = arith.constant 0 : i32
    %c0_i32_0 = arith.constant 0 : i32
    %c0_i32_1 = arith.constant 0 : i32
    return %c0_i32, %c0_i32_0 : i32, i32
  }
  func.func @transform_5(%arg0: i32) -> (i32, i32) {
    %c0_i32 = arith.constant 0 : i32
    %c0_i32_0 = arith.constant 0 : i32
    %c0_i32_1 = arith.constant 0 : i32
    return %c0_i32, %c0_i32_0 : i32, i32
  }
  func.func @transform_6(%arg0: i32) -> (i32, i32) {
    %c0_i32 = arith.constant 0 : i32
    %c0_i32_0 = arith.constant 0 : i32
    %c0_i32_1 = arith.constant 0 : i32
    return %c0_i32, %c0_i32_0 : i32, i32
  }
  func.func @transform_7(%arg0: i32) -> (i32, i32) {
    %c0_i32 = arith.constant 0 : i32
    %c0_i32_0 = arith.constant 0 : i32
    return %arg0, %c0_i32 : i32, i32
  }
}

</mosaic_0001>

<bundles_post_ra>
// kernel: tpu_custom_call.1
= control target key start
LH: loop header
LB: loop body
LE: loop exit
PB: predicated region body
PF: predicated region fallthrough
CT: control target
= control target key end

     0   :  { %12 = vsyncpa [#allocation3], 0  ;;  %s1115_s0 = inlined_call_operand.hbm [shape: f32[8,128], index: 0, kind: input, shape index: {}]   ;;  %s1116_s1 = inlined_call_operand.hbm [shape: bf16[128,256], index: 1, kind: input, shape index: {}]   ;;  %s1117_s2 = inlined_call_operand.vmem [shape: f32[1,256], index: 2, kind: input, shape index: {}]   ;;  %s1118_s3 = inlined_call_operand.hbm [shape: bf16[256,256], index: 3, kind: input, shape index: {}]   ;;  %s1119_s4 = inlined_call_operand.vmem [shape: f32[1,256], index: 4, kind: input, shape index: {}]   ;;  %s1120_s5 = inlined_call_operand.hbm [shape: bf16[256,128], index: 5, kind: input, shape index: {}]   ;;  %s1121_s6 = inlined_call_operand.vmem [shape: f32[1,128], index: 6, kind: input, shape index: {}]   ;;  %s1122_s7 = inlined_call_operand.hbm [shape: f32[8,128], index: 7, kind: output, shape index: {}]  }
   0x1   :  { %13 = vsyncpa [#allocation6], 0 }
   0x2   :  { %14 = vsyncpa [#allocation9], 0 }
   0x3   :  { %15 = vsyncpa [#allocation4], 0  ;;  %s990_s24 = smov [#allocation5]   ;;  %s872_s28 = scalar_lea.hbm %s1116_s1, 2048 }
   0x4   :  { %s31_s25 = sshll.u32 %s990_s24, 4  ;;  %p873_p0 = scmp.ne.s32.totalorder %s1116_s1, %s872_s28  ;;  %s32_s25 = int_to_ptr.vmem [resolvable:$true] %s31_s25 }
   0x5   :  { %p876_p1 = scmp.lt.u32.totalorder %s872_s28, %s1116_s1 }
   0x7   :  { %p878_p2 = pnand %p876_p1, %p873_p0 }
   0x9   :  { %881 = shalt.err (!%p878_p2)
}
   0xa   :  { %s882_s10 = scalar_lea.vmem %s32_s25, 2048  ;;  %p887_p4 = scmp.lt.s32.totalorder %s32_s25, %s32_s25 }
   0xb   :  { %p883_p3 = scmp.ne.s32.totalorder %s32_s25, %s882_s10  ;;  %p888_p5 = scmp.lt.s32.totalorder %s882_s10, %s882_s10 }
   0xd   :  { %p889_p6 = por %p888_p5, %p887_p4 }
   0xf   :  { %p890_p7 = pnand %p889_p6, %p883_p3 }
  0x11   :  { %893 = shalt.err (!%p890_p7)
}
  0x12   :  { %s991_s11 = smov 128   ;;  %s992_s12 = smov 8  }
  0x13   :  { %37 = dma.hbm_to_vmem [thread:$0]  %s1116_s1, 2048, %s32_s25, [#allocation6], %s991_s11, %s991_s11, %s992_s12  }
  0x14   :  { %s993_s15 = smov [#allocation2]   ;;  %s994_s17 = smov [#allocation7]  }
  0x15   :  { %s22_s16 = sshll.u32 %s993_s15, 4  ;;  %s45_s18 = sshll.u32 %s994_s17, 4  ;;  %s23_s16 = int_to_ptr.vmem [resolvable:$true] %s22_s16  ;;  %s46_s18 = int_to_ptr.vmem [resolvable:$true] %s45_s18 }
  0x16   :  { %s894_s21 = scalar_lea.hbm %s1115_s0, 128 }
  0x17   :  { %p895_p8 = scmp.ne.s32.totalorder %s1115_s0, %s894_s21  ;;  %p898_p9 = scmp.lt.u32.totalorder %s894_s21, %s1115_s0 }
  0x19   :  { %p900_p10 = pnand %p898_p9, %p895_p8 }
  0x1b   :  { %903 = shalt.err (!%p900_p10)
}
  0x1c   :  { %s904_s1 = scalar_lea.vmem %s23_s16, 128  ;;  %p909_p12 = scmp.lt.s32.totalorder %s23_s16, %s23_s16 }
  0x1d   :  { %p905_p11 = scmp.ne.s32.totalorder %s23_s16, %s904_s1  ;;  %p910_p13 = scmp.lt.s32.totalorder %s904_s1, %s904_s1 }
  0x1f   :  { %p911_p0 = por %p910_p13, %p909_p12 }
  0x21   :  { %p912_p1 = pnand %p911_p0, %p905_p11 }
  0x23   :  { %915 = shalt.err (!%p912_p1)
}
  0x24   :  { %25 = dma.hbm_to_vmem [thread:$0]  %s1115_s0, 128, %s23_s16, [#allocation3]  }
  0x25   :  { %s916_s30 = scalar_lea.hbm %s1118_s3, 4096 }
  0x26   :  { %p917_p2 = scmp.ne.s32.totalorder %s1118_s3, %s916_s30  ;;  %p920_p3 = scmp.lt.u32.totalorder %s916_s30, %s1118_s3 }
  0x28   :  { %p922_p4 = pnand %p920_p3, %p917_p2 }
  0x2a   :  { %925 = shalt.err (!%p922_p4)
}
  0x2b   :  { %s926_s14 = scalar_lea.vmem %s46_s18, 4096  ;;  %p931_p6 = scmp.lt.s32.totalorder %s46_s18, %s46_s18 }
  0x2c   :  { %p927_p5 = scmp.ne.s32.totalorder %s46_s18, %s926_s14  ;;  %p932_p7 = scmp.lt.s32.totalorder %s926_s14, %s926_s14 }
  0x2e   :  { %p933_p8 = por %p932_p7, %p931_p6 }
  0x30   :  { %p934_p9 = pnand %p933_p8, %p927_p5 }
  0x32   :  { %937 = shalt.err (!%p934_p9)
}
  0x33   :  { %51 = dma.hbm_to_vmem [thread:$0]  %s1118_s3, 4096, %s46_s18, [#allocation6], %s991_s11, %s991_s11, %s992_s12  }
  0x34   :  { %s995_s16 = smov [#allocation8]   ;;  %s938_s21 = scalar_lea.hbm %s1120_s5, 2048 }
  0x35   :  { %s59_s17 = sshll.u32 %s995_s16, 4  ;;  %p939_p10 = scmp.ne.s32.totalorder %s1120_s5, %s938_s21  ;;  %s60_s17 = int_to_ptr.vmem [resolvable:$true] %s59_s17 }
  0x36   :  { %p942_p11 = scmp.lt.u32.totalorder %s938_s21, %s1120_s5 }
  0x38   :  { %p944_p12 = pnand %p942_p11, %p939_p10 }
  0x3a   :  { %947 = shalt.err (!%p944_p12)
}
  0x3b   :  { %s948_s1 = scalar_lea.vmem %s60_s17, 2048  ;;  %p953_p0 = scmp.lt.s32.totalorder %s60_s17, %s60_s17 }
  0x3c   :  { %p949_p13 = scmp.ne.s32.totalorder %s60_s17, %s948_s1  ;;  %p954_p1 = scmp.lt.s32.totalorder %s948_s1, %s948_s1 }
  0x3e   :  { %p955_p2 = por %p954_p1, %p953_p0 }
  0x40   :  { %p956_p3 = pnand %p955_p2, %p949_p13 }
  0x42   :  { %959 = shalt.err (!%p956_p3)
}
  0x43   :  { %s996_s3 = smov 64   ;;  %s997_s11 = smov 4  }
  0x44   :  { %65 = dma.hbm_to_vmem [thread:$0]  %s1120_s5, 2048, %s60_s17, [#allocation9], %s996_s3, %s996_s3, %s997_s11  }
  0x45   :  { %982 = dma.done.wait [#allocation3], 128  }
  0x46   :  { %983 = vsyncadd [#allocation3], 4294967168 }
  0x47   :  { %984 = dma.done.wait [#allocation6], 6144  }
  0x48   :  { %985 = vsyncadd [#allocation6], 4294961152 }
  0x49   :  { %986 = dma.done.wait [#allocation9], 2048  }
  0x4a   :  { %987 = vsyncadd [#allocation9], 4294965248  ;;  %v998_v0 = vmov 0   ;;  %v782_v1 = vld [vmem:[#allocation5 + $0x4] ss:$8 sps:$4 sm:$0xff]   ;;  %v81_v26 = vld [vmem:[#allocation2] sm:$0xff]  ;;  %v101_v63 = vlaneseq }
  0x4b   :  { %223 = vmatprep.mubr.bf16.mxu0 %v998_v0  ;;  %v784_v2 = vld [vmem:[#allocation5] ss:$8 sps:$4 sm:$0xff]   ;;  %191 = vmatprep.subr.bf16.mxu0 %v782_v1  ;;  %v785_v3 = vld [vmem:[#allocation5 + $0x14] ss:$8 sps:$4 sm:$0xff]   ;;  %v787_v4 = vld [vmem:[#allocation5 + $0x10] ss:$8 sps:$4 sm:$0xff]   ;;  %v82_v31 = vpack.c.bf16 %v81_v26, %v81_v26 }
  0x4c   :  { %192 = vmatpush1.bf16.msra.mxu0 %v784_v2  ;;  %v788_v5 = vld [vmem:[#allocation5 + $0x24] ss:$8 sps:$4 sm:$0xff]   ;;  %v790_v6 = vld [vmem:[#allocation5 + $0x20] ss:$8 sps:$4 sm:$0xff]   ;;  %v791_v7 = vld [vmem:[#allocation5 + $0x34] ss:$8 sps:$4 sm:$0xff]  }
  0x4d   :  { %193 = vmatprep.subr.bf16.mxu0 %v785_v3  ;;  %v793_v8 = vld [vmem:[#allocation5 + $0x30] ss:$8 sps:$4 sm:$0xff]   ;;  %v794_v9 = vld [vmem:[#allocation5 + $0x44] ss:$8 sps:$4 sm:$0xff]   ;;  %v808_v11 = vld [vmem:[#allocation7] ss:$8 sps:$4 sm:$0xff]  }
  0x4e   :  { %v806_v10 = vld [vmem:[#allocation7 + $0x4] ss:$8 sps:$4 sm:$0xff]   ;;  %v809_v12 = vld [vmem:[#allocation7 + $0x14] ss:$8 sps:$4 sm:$0xff]   ;;  %v796_v13 = vld [vmem:[#allocation5 + $0x40] ss:$8 sps:$4 sm:$0xff]  }
  0x4f   :  { %440 = vmatprep.subr.bf16.mxu1 %v806_v10  ;;  %v811_v14 = vld [vmem:[#allocation7 + $0x10] ss:$8 sps:$4 sm:$0xff]   ;;  %v812_v15 = vld [vmem:[#allocation7 + $0x24] ss:$8 sps:$4 sm:$0xff]   ;;  %v797_v16 = vld [vmem:[#allocation5 + $0x54] ss:$8 sps:$4 sm:$0xff]  }
  0x50   :  { %194 = vmatpush1.bf16.msra.mxu0 %v787_v4  ;;  %441 = vmatpush1.bf16.msra.mxu1 %v808_v11  ;;  %v799_v17 = vld [vmem:[#allocation5 + $0x50] ss:$8 sps:$4 sm:$0xff]   ;;  %v814_v18 = vld [vmem:[#allocation7 + $0x20] ss:$8 sps:$4 sm:$0xff]   ;;  %v815_v19 = vld [vmem:[#allocation7 + $0x34] ss:$8 sps:$4 sm:$0xff]  }
  0x51   :  { %195 = vmatprep.subr.bf16.mxu0 %v788_v5  ;;  %442 = vmatprep.subr.bf16.mxu1 %v809_v12  ;;  %v800_v20 = vld [vmem:[#allocation5 + $0x64] ss:$8 sps:$4 sm:$0xff]   ;;  %v802_v21 = vld [vmem:[#allocation5 + $0x60] ss:$8 sps:$4 sm:$0xff]   ;;  %v817_v22 = vld [vmem:[#allocation7 + $0x30] ss:$8 sps:$4 sm:$0xff]  }
  0x52   :  { %v818_v23 = vld [vmem:[#allocation7 + $0x44] ss:$8 sps:$4 sm:$0xff]   ;;  %v803_v24 = vld [vmem:[#allocation5 + $0x74] ss:$8 sps:$4 sm:$0xff]   ;;  %v805_v25 = vld [vmem:[#allocation5 + $0x70] ss:$8 sps:$4 sm:$0xff]  }
  0x53   :  { %v820_v27 = vld [vmem:[#allocation7 + $0x40] ss:$8 sps:$4 sm:$0xff]   ;;  %v821_v28 = vld [vmem:[#allocation7 + $0x54] ss:$8 sps:$4 sm:$0xff]   ;;  %v823_v29 = vld [vmem:[#allocation7 + $0x50] ss:$8 sps:$4 sm:$0xff]  }
  0x54   :  { %196 = vmatpush1.bf16.msra.mxu0 %v790_v6  ;;  %443 = vmatpush1.bf16.msra.mxu1 %v811_v14  ;;  %v824_v30 = vld [vmem:[#allocation7 + $0x64] ss:$8 sps:$4 sm:$0xff]   ;;  %v826_v32 = vld [vmem:[#allocation7 + $0x60] ss:$8 sps:$4 sm:$0xff]   ;;  %v827_v33 = vld [vmem:[#allocation7 + $0x74] ss:$8 sps:$4 sm:$0xff]  }
  0x55   :  { %197 = vmatprep.subr.bf16.mxu0 %v791_v7  ;;  %444 = vmatprep.subr.bf16.mxu1 %v812_v15  ;;  %v829_v34 = vld [vmem:[#allocation7 + $0x70] ss:$8 sps:$4 sm:$0xff]   ;;  %v830_v35 = vld [vmem:[#allocation7 + $0x84] ss:$8 sps:$4 sm:$0xff]   ;;  %v832_v36 = vld [vmem:[#allocation7 + $0x80] ss:$8 sps:$4 sm:$0xff]  }
  0x56   :  { %v833_v37 = vld [vmem:[#allocation7 + $0x94] ss:$8 sps:$4 sm:$0xff]   ;;  %v835_v38 = vld [vmem:[#allocation7 + $0x90] ss:$8 sps:$4 sm:$0xff]   ;;  %v836_v39 = vld [vmem:[#allocation7 + $0xa4] ss:$8 sps:$4 sm:$0xff]  }
  0x57   :  { %v838_v40 = vld [vmem:[#allocation7 + $0xa0] ss:$8 sps:$4 sm:$0xff]   ;;  %v839_v41 = vld [vmem:[#allocation7 + $0xb4] ss:$8 sps:$4 sm:$0xff]   ;;  %v841_v42 = vld [vmem:[#allocation7 + $0xb0] ss:$8 sps:$4 sm:$0xff]  }
  0x58   :  { %198 = vmatpush1.bf16.msra.mxu0 %v793_v8  ;;  %445 = vmatpush1.bf16.msra.mxu1 %v814_v18  ;;  %v842_v43 = vld [vmem:[#allocation7 + $0xc4] ss:$8 sps:$4 sm:$0xff]   ;;  %v844_v44 = vld [vmem:[#allocation7 + $0xc0] ss:$8 sps:$4 sm:$0xff]   ;;  %v845_v45 = vld [vmem:[#allocation7 + $0xd4] ss:$8 sps:$4 sm:$0xff]  }
  0x59   :  { %199 = vmatprep.subr.bf16.mxu0 %v794_v9  ;;  %446 = vmatprep.subr.bf16.mxu1 %v815_v19  ;;  %v847_v46 = vld [vmem:[#allocation7 + $0xd0] ss:$8 sps:$4 sm:$0xff]   ;;  %v848_v47 = vld [vmem:[#allocation7 + $0xe4] ss:$8 sps:$4 sm:$0xff]   ;;  %v850_v48 = vld [vmem:[#allocation7 + $0xe0] ss:$8 sps:$4 sm:$0xff]  }
  0x5a   :  { %v851_v49 = vld [vmem:[#allocation7 + $0xf4] ss:$8 sps:$4 sm:$0xff]   ;;  %v853_v50 = vld [vmem:[#allocation7 + $0xf0] ss:$8 sps:$4 sm:$0xff]   ;;  %v854_v51 = vld [vmem:[#allocation8 + $0x40] sm:$0xff]   ;;  %v102_v0 = vshrl.u32 %v101_v63, 7 }
  0x5b   :  { %v855_v52 = vld [vmem:[#allocation8] sm:$0xff]   ;;  %v856_v53 = vld [vmem:[#allocation8 + $0x48] sm:$0xff]   ;;  %v858_v55 = vld [vmem:[#allocation8 + $0x50] sm:$0xff]  }
  0x5c   :  { %200 = vmatpush1.bf16.msra.mxu0 %v796_v13  ;;  %447 = vmatpush1.bf16.msra.mxu1 %v817_v22  ;;  %v857_v54 = vld [vmem:[#allocation8 + $0x8] sm:$0xff]   ;;  %v859_v56 = vld [vmem:[#allocation8 + $0x10] sm:$0xff]   ;;  %v860_v57 = vld [vmem:[#allocation8 + $0x58] sm:$0xff]   ;;  %v103_v1 = vsub.s32 0, %v102_v0  ;;  %v107_v3 = vsub.s32 1, %v102_v0 }
  0x5d   :  { %201 = vmatprep.subr.bf16.mxu0 %v797_v16  ;;  %448 = vmatprep.subr.bf16.mxu1 %v818_v23  ;;  %v861_v58 = vld [vmem:[#allocation8 + $0x18] sm:$0xff]   ;;  %v862_v59 = vld [vmem:[#allocation8 + $0x60] sm:$0xff]   ;;  %v864_v61 = vld [vmem:[#allocation8 + $0x68] sm:$0xff]  }
  0x5e   :  { %v863_v60 = vld [vmem:[#allocation8 + $0x20] sm:$0xff]   ;;  %v865_v62 = vld [vmem:[#allocation8 + $0x28] sm:$0xff]   ;;  %v99_v2 = vld [vmem:[%s1117_s2] sm:$0x3] }
  0x5f   :  { %v104_v4 = vrot.slane %v99_v2, %v103_v1  ;;  %v108_v5 = vrot.slane %v99_v2, %v107_v3  ;;  %v866_v16 = vld [vmem:[#allocation8 + $0x70] sm:$0xff]   ;;  %v868_v18 = vld [vmem:[#allocation8 + $0x78] sm:$0xff]  }
  0x60   :  { %202 = vmatpush1.bf16.msra.mxu0 %v799_v17  ;;  %449 = vmatpush1.bf16.msra.mxu1 %v820_v27  ;;  %v867_v17 = vld [vmem:[#allocation8 + $0x30] sm:$0xff]   ;;  %v869_v19 = vld [vmem:[#allocation8 + $0x38] sm:$0xff]  }
  0x61   :  { %203 = vmatprep.subr.bf16.mxu0 %v800_v20  ;;  %450 = vmatprep.subr.bf16.mxu1 %v821_v28  ;;  %v268_v20 = vld [vmem:[%s1119_s4] sm:$0x3]  ;;  %s999_s4 = smov [#allocation10]  }
  0x62   :  { %v277_v22 = vrot.slane %v268_v20, %v107_v3  ;;  %s674_s30 = sshll.u32 %s999_s4, 4  ;;  %s675_s30 = int_to_ptr.vmem [resolvable:$true] %s674_s30 }
  0x63   :  { %s960_s8 = scalar_lea.vmem %s675_s30, 128  ;;  %p965_p5 = scmp.lt.s32.totalorder %s675_s30, %s675_s30 }
  0x64   :  { %204 = vmatpush1.bf16.msra.mxu0 %v802_v21  ;;  %451 = vmatpush1.bf16.msra.mxu1 %v823_v29  ;;  %v273_v21 = vrot.slane %v268_v20, %v103_v1  ;;  %p961_p4 = scmp.ne.s32.totalorder %s675_s30, %s960_s8  ;;  %p966_p6 = scmp.lt.s32.totalorder %s960_s8, %s960_s8 }
  0x65   :  { %205 = vmatprep.subr.bf16.mxu0 %v803_v24  ;;  %452 = vmatprep.subr.bf16.mxu1 %v824_v30 }
  0x66   :  { %p967_p7 = por %p966_p6, %p965_p5 }
  0x68   :  { %206 = vmatpush1.bf16.msra.mxu0 %v805_v25  ;;  %453 = vmatpush1.bf16.msra.mxu1 %v826_v32  ;;  %p968_p8 = pnand %p967_p7, %p961_p4 }
  0x69   :  { %454 = vmatprep.subr.bf16.mxu1 %v827_v33  ;;  %750 = vmatprep.subr.bf16.mxu0 %v854_v51 }
  0x6b   :  { %224 = vmatmul.mubr.bf16.vlgmr.msra.gmra.mrb[0].mxu0 %v82_v31 }
  0x6c   :  { %455 = vmatpush1.bf16.msra.mxu1 %v829_v34  ;;  %751 = vmatpush3.bf16.msra.mxu0 %v855_v52  ;;  %v733_v34 = vld [vmem:[%s1121_s6] ss:$0 sm:$0xff] }
  0x6d   :  { %456 = vmatprep.subr.bf16.mxu1 %v830_v35  ;;  %752 = vmatprep.subr.bf16.mxu0 %v856_v53 }
  0x70   :  { %457 = vmatpush1.bf16.msra.mxu1 %v832_v36  ;;  %753 = vmatpush3.bf16.msra.mxu0 %v857_v54 }
  0x71   :  { %458 = vmatprep.subr.bf16.mxu1 %v833_v37  ;;  %754 = vmatprep.subr.bf16.mxu0 %v858_v55 }
  0x74   :  { %459 = vmatpush1.bf16.msra.mxu1 %v835_v38  ;;  %755 = vmatpush3.bf16.msra.mxu0 %v859_v56 }
  0x75   :  { %460 = vmatprep.subr.bf16.mxu1 %v836_v39  ;;  %756 = vmatprep.subr.bf16.mxu0 %v860_v57 }
  0x78   :  { %461 = vmatpush1.bf16.msra.mxu1 %v838_v40  ;;  %757 = vmatpush3.bf16.msra.mxu0 %v861_v58  ;;  %v664_v40 = vand.u32 127, %v101_v63 }
  0x79   :  { %462 = vmatprep.subr.bf16.mxu1 %v839_v41  ;;  %758 = vmatprep.subr.bf16.mxu0 %v862_v59 }
  0x7a   :  { %vm665_vm0 = vcmp.lt.s32.totalorder %v664_v40, 8 }
  0x7c   :  { %463 = vmatpush1.bf16.msra.mxu1 %v841_v42  ;;  %759 = vmatpush3.bf16.msra.mxu0 %v863_v60 }
  0x7d   :  { %464 = vmatprep.subr.bf16.mxu1 %v842_v43  ;;  %760 = vmatprep.subr.bf16.mxu0 %v864_v61 }
  0x80   :  { %465 = vmatpush1.bf16.msra.mxu1 %v844_v44  ;;  %761 = vmatpush3.bf16.msra.mxu0 %v865_v62 }
  0x81   :  { %466 = vmatprep.subr.bf16.mxu1 %v845_v45  ;;  %762 = vmatprep.subr.bf16.mxu0 %v866_v16 }
  0x84   :  { %467 = vmatpush1.bf16.msra.mxu1 %v847_v46  ;;  %763 = vmatpush3.bf16.msra.mxu0 %v867_v17 }
  0x85   :  { %468 = vmatprep.subr.bf16.mxu1 %v848_v47  ;;  %764 = vmatprep.subr.bf16.mxu0 %v868_v18 }
  0x88   :  { %469 = vmatpush1.bf16.msra.mxu1 %v850_v48  ;;  %765 = vmatpush3.bf16.msra.mxu0 %v869_v19 }
  0x89   :  { %470 = vmatprep.subr.bf16.mxu1 %v851_v49 }
  0x8c   :  { %471 = vmatpush1.bf16.msra.mxu1 %v853_v50 }
 0x13e   :  { %v225_v6 = vpop.f32.mrb[0].mxu0 }
 0x13f   :  { %v226_v7 = vadd.f32 %v225_v6, %v104_v4  ;;  %v227_v8 = vpop.f32.mrb[1].mxu0 }
 0x140   :  { %v228_v9 = vadd.f32 %v227_v8, %v108_v5  ;;  %v229_v10 = vpop.f32.mrb[2].mxu0 }
 0x141   :  { %v232_v11 = vmax.f32 %v226_v7, 0.0  ;;  %v230_v12 = vpop.f32.mrb[3].mxu0 }
 0x142   :  { %v233_v13 = vmax.f32 %v228_v9, 0.0 }
 0x143   :  { %v234_v15 = vpack.c.bf16 %v232_v11, %v232_v11 }
 0x144   :  { %v235_v14 = vpack.c.bf16 %v233_v13, %v233_v13 }
 0x146   :  { %472 = vmatprep.mubr.bf16.mxu1 %v235_v14 }
 0x147   :  { %473 = vmatmul.mubr.bf16.vlgmr.msra.gmra.mrb[0].mxu1 %v234_v15 }
 0x21a   :  { %v474_v23 = vpop.f32.mrb[0].mxu1 }
 0x21b   :  { %v475_v24 = vadd.f32 %v474_v23, %v273_v21  ;;  %v476_v25 = vpop.f32.mrb[1].mxu1 }
 0x21c   :  { %v477_v26 = vadd.f32 %v476_v25, %v277_v22  ;;  %v478_v27 = vpop.f32.mrb[2].mxu1 }
 0x21d   :  { %v481_v28 = vmax.f32 %v475_v24, 0.0  ;;  %v479_v29 = vpop.f32.mrb[3].mxu1 }
 0x21e   :  { %v482_v30 = vmax.f32 %v477_v26, 0.0 }
 0x21f   :  { %v483_v32 = vpack.c.bf16 %v481_v28, %v481_v28 }
 0x220   :  { %v484_v31 = vpack.c.bf16 %v482_v30, %v482_v30 }
 0x222   :  { %652 = vmatprep.mubr.bf16.mxu0 %v484_v31 }
 0x223   :  { %653 = vmatmul.mubr.bf16.vlgmr.msra.gmra.mrb[4].mxu0 %v483_v32 }
 0x2f6   :  { %v766_v33 = vpop.f32.mrb[4].mxu0 }
 0x2f7   :  { %v767_v35 = vpop.f32.mrb[5].mxu0 }
 0x2f8   :  { %v768_v36 = vadd.f32 %v767_v35, %v766_v33  ;;  %v769_v37 = vpop.f32.mrb[6].mxu0 }
 0x2f9   :  { %v770_v38 = vpop.f32.mrb[7].mxu0 }
 0x2fa   :  { %v655_v39 = vadd.f32 %v768_v36, %v733_v34 }
 0x2fc   :  { %870 = vtanh.f32 %v655_v39 }
 0x306   :  { %v871_v41 = vpop.eup %870 }
 0x307   :  { %v661_v42 = vmul.f32 3.5, %v871_v41 }
 0x309   :  { %v662_v43 = vadd.f32 -1.5, %v661_v42 }
 0x30b   :  { %v666_v44 = vsel %vm665_vm0, %v655_v39, %v662_v43 }
 0x30c   :  { %667 = vst [vmem:[#allocation10] sm:$0xff] %v666_v44 }
 0x30d   :  { %971 = shalt.err (!%p968_p8)
}
 0x30e   :  { %s972_s10 = scalar_lea.hbm %s1122_s7, 128 }
 0x30f   :  { %p973_p9 = scmp.ne.s32.totalorder %s1122_s7, %s972_s10  ;;  %p976_p10 = scmp.lt.u32.totalorder %s972_s10, %s1122_s7 }
 0x311   :  { %p978_p11 = pnand %p976_p10, %p973_p9 }
 0x313   :  { %981 = shalt.err (!%p978_p11)
}
 0x314   :  { %677 = dma.vmem_to_hbm [thread:$0]  %s675_s30, 128, %s1122_s7, [#allocation4]  }
 0x315   :  { %988 = dma.done.wait [#allocation4], 128  }
 0x316   :  { %989 = vsyncadd [#allocation4], 4294967168 }
 0x317   :  { %681 = vsyncpa [#allocation3], 1 }
 0x318   :  { %682 = vsyncpa [#allocation6], 1 }
 0x319   :  { %683 = vsyncpa [#allocation9], 1 }
 0x31a   :  { %684 = vsyncpa [#allocation4], 1 }

// kernel: tpu_custom_call.1
= control target key start
LH: loop header
LB: loop body
LE: loop exit
PB: predicated region body
PF: predicated region fallthrough
CT: control target
= control target key end

     0   :  { %12 = vsyncpa [#allocation3], 0  ;;  %s1115_s0 = inlined_call_operand.hbm [shape: f32[8,128], index: 0, kind: input, shape index: {}]   ;;  %s1116_s1 = inlined_call_operand.hbm [shape: bf16[128,256], index: 1, kind: input, shape index: {}]   ;;  %s1117_s2 = inlined_call_operand.vmem [shape: f32[1,256], index: 2, kind: input, shape index: {}]   ;;  %s1118_s3 = inlined_call_operand.hbm [shape: bf16[256,256], index: 3, kind: input, shape index: {}]   ;;  %s1119_s4 = inlined_call_operand.vmem [shape: f32[1,256], index: 4, kind: input, shape index: {}]   ;;  %s1120_s5 = inlined_call_operand.hbm [shape: bf16[256,128], index: 5, kind: input, shape index: {}]   ;;  %s1121_s6 = inlined_call_operand.vmem [shape: f32[1,128], index: 6, kind: input, shape index: {}]   ;;  %s1122_s7 = inlined_call_operand.hbm [shape: f32[8,128], index: 7, kind: output, shape index: {}]  }
   0x1   :  { %13 = vsyncpa [#allocation6], 0 }
   0x2   :  { %14 = vsyncpa [#allocation9], 0 }
   0x3   :  { %15 = vsyncpa [#allocation4], 0  ;;  %s990_s24 = smov [#allocation5]   ;;  %s872_s28 = scalar_lea.hbm %s1116_s1, 2048 }
   0x4   :  { %s31_s25 = sshll.u32 %s990_s24, 4  ;;  %p873_p0 = scmp.ne.s32.totalorder %s1116_s1, %s872_s28  ;;  %s32_s25 = int_to_ptr.vmem [resolvable:$true] %s31_s25 }
   0x5   :  { %p876_p1 = scmp.lt.u32.totalorder %s872_s28, %s1116_s1 }
   0x7   :  { %p878_p2 = pnand %p876_p1, %p873_p0 }
   0x9   :  { %881 = shalt.err (!%p878_p2)
}
   0xa   :  { %s882_s10 = scalar_lea.vmem %s32_s25, 2048  ;;  %p887_p4 = scmp.lt.s32.totalorder %s32_s25, %s32_s25 }
   0xb   :  { %p883_p3 = scmp.ne.s32.totalorder %s32_s25, %s882_s10  ;;  %p888_p5 = scmp.lt.s32.totalorder %s882_s10, %s882_s10 }
   0xd   :  { %p889_p6 = por %p888_p5, %p887_p4 }
   0xf   :  { %p890_p7 = pnand %p889_p6, %p883_p3 }
  0x11   :  { %893 = shalt.err (!%p890_p7)
}
  0x12   :  { %s991_s11 = smov 128   ;;  %s992_s12 = smov 8  }
  0x13   :  { %37 = dma.hbm_to_vmem [thread:$0]  %s1116_s1, 2048, %s32_s25, [#allocation6], %s991_s11, %s991_s11, %s992_s12  }
  0x14   :  { %s993_s15 = smov [#allocation2]   ;;  %s994_s17 = smov [#allocation7]  }
  0x15   :  { %s22_s16 = sshll.u32 %s993_s15, 4  ;;  %s45_s18 = sshll.u32 %s994_s17, 4  ;;  %s23_s16 = int_to_ptr.vmem [resolvable:$true] %s22_s16  ;;  %s46_s18 = int_to_ptr.vmem [resolvable:$true] %s45_s18 }
  0x16   :  { %s894_s21 = scalar_lea.hbm %s1115_s0, 128 }
  0x17   :  { %p895_p8 = scmp.ne.s32.totalorder %s1115_s0, %s894_s21  ;;  %p898_p9 = scmp.lt.u32.totalorder %s894_s21, %s1115_s0 }
  0x19   :  { %p900_p10 = pnand %p898_p9, %p895_p8 }
  0x1b   :  { %903 = shalt.err (!%p900_p10)
}
  0x1c   :  { %s904_s1 = scalar_lea.vmem %s23_s16, 128  ;;  %p909_p12 = scmp.lt.s32.totalorder %s23_s16, %s23_s16 }
  0x1d   :  { %p905_p11 = scmp.ne.s32.totalorder %s23_s16, %s904_s1  ;;  %p910_p13 = scmp.lt.s32.totalorder %s904_s1, %s904_s1 }
  0x1f   :  { %p911_p0 = por %p910_p13, %p909_p12 }
  0x21   :  { %p912_p1 = pnand %p911_p0, %p905_p11 }
  0x23   :  { %915 = shalt.err (!%p912_p1)
}
  0x24   :  { %25 = dma.hbm_to_vmem [thread:$0]  %s1115_s0, 128, %s23_s16, [#allocation3]  }
  0x25   :  { %s916_s30 = scalar_lea.hbm %s1118_s3, 4096 }
  0x26   :  { %p917_p2 = scmp.ne.s32.totalorder %s1118_s3, %s916_s30  ;;  %p920_p3 = scmp.lt.u32.totalorder %s916_s30, %s1118_s3 }
  0x28   :  { %p922_p4 = pnand %p920_p3, %p917_p2 }
  0x2a   :  { %925 = shalt.err (!%p922_p4)
}
  0x2b   :  { %s926_s14 = scalar_lea.vmem %s46_s18, 4096  ;;  %p931_p6 = scmp.lt.s32.totalorder %s46_s18, %s46_s18 }
  0x2c   :  { %p927_p5 = scmp.ne.s32.totalorder %s46_s18, %s926_s14  ;;  %p932_p7 = scmp.lt.s32.totalorder %s926_s14, %s926_s14 }
  0x2e   :  { %p933_p8 = por %p932_p7, %p931_p6 }
  0x30   :  { %p934_p9 = pnand %p933_p8, %p927_p5 }
  0x32   :  { %937 = shalt.err (!%p934_p9)
}
  0x33   :  { %51 = dma.hbm_to_vmem [thread:$0]  %s1118_s3, 4096, %s46_s18, [#allocation6], %s991_s11, %s991_s11, %s992_s12  }
  0x34   :  { %s995_s16 = smov [#allocation8]   ;;  %s938_s21 = scalar_lea.hbm %s1120_s5, 2048 }
  0x35   :  { %s59_s17 = sshll.u32 %s995_s16, 4  ;;  %p939_p10 = scmp.ne.s32.totalorder %s1120_s5, %s938_s21  ;;  %s60_s17 = int_to_ptr.vmem [resolvable:$true] %s59_s17 }
  0x36   :  { %p942_p11 = scmp.lt.u32.totalorder %s938_s21, %s1120_s5 }
  0x38   :  { %p944_p12 = pnand %p942_p11, %p939_p10 }
  0x3a   :  { %947 = shalt.err (!%p944_p12)
}
  0x3b   :  { %s948_s1 = scalar_lea.vmem %s60_s17, 2048  ;;  %p953_p0 = scmp.lt.s32.totalorder %s60_s17, %s60_s17 }
  0x3c   :  { %p949_p13 = scmp.ne.s32.totalorder %s60_s17, %s948_s1  ;;  %p954_p1 = scmp.lt.s32.totalorder %s948_s1, %s948_s1 }
  0x3e   :  { %p955_p2 = por %p954_p1, %p953_p0 }
  0x40   :  { %p956_p3 = pnand %p955_p2, %p949_p13 }
  0x42   :  { %959 = shalt.err (!%p956_p3)
}
  0x43   :  { %s996_s3 = smov 64   ;;  %s997_s11 = smov 4  }
  0x44   :  { %65 = dma.hbm_to_vmem [thread:$0]  %s1120_s5, 2048, %s60_s17, [#allocation9], %s996_s3, %s996_s3, %s997_s11  }
  0x45   :  { %982 = dma.done.wait [#allocation3], 128  }
  0x46   :  { %983 = vsyncadd [#allocation3], 4294967168 }
  0x47   :  { %984 = dma.done.wait [#allocation6], 6144  }
  0x48   :  { %985 = vsyncadd [#allocation6], 4294961152 }
  0x49   :  { %986 = dma.done.wait [#allocation9], 2048  }
  0x4a   :  { %987 = vsyncadd [#allocation9], 4294965248  ;;  %v998_v0 = vmov 0   ;;  %v782_v1 = vld [vmem:[#allocation5 + $0x4] ss:$8 sps:$4 sm:$0xff]   ;;  %v81_v26 = vld [vmem:[#allocation2] sm:$0xff]  ;;  %v101_v63 = vlaneseq }
  0x4b   :  { %223 = vmatprep.mubr.bf16.mxu0 %v998_v0  ;;  %v784_v2 = vld [vmem:[#allocation5] ss:$8 sps:$4 sm:$0xff]   ;;  %191 = vmatprep.subr.bf16.mxu0 %v782_v1  ;;  %v785_v3 = vld [vmem:[#allocation5 + $0x14] ss:$8 sps:$4 sm:$0xff]   ;;  %v787_v4 = vld [vmem:[#allocation5 + $0x10] ss:$8 sps:$4 sm:$0xff]   ;;  %v82_v31 = vpack.c.bf16 %v81_v26, %v81_v26 }
  0x4c   :  { %192 = vmatpush1.bf16.msra.mxu0 %v784_v2  ;;  %v788_v5 = vld [vmem:[#allocation5 + $0x24] ss:$8 sps:$4 sm:$0xff]   ;;  %v790_v6 = vld [vmem:[#allocation5 + $0x20] ss:$8 sps:$4 sm:$0xff]   ;;  %v791_v7 = vld [vmem:[#allocation5 + $0x34] ss:$8 sps:$4 sm:$0xff]  }
  0x4d   :  { %193 = vmatprep.subr.bf16.mxu0 %v785_v3  ;;  %v793_v8 = vld [vmem:[#allocation5 + $0x30] ss:$8 sps:$4 sm:$0xff]   ;;  %v794_v9 = vld [vmem:[#allocation5 + $0x44] ss:$8 sps:$4 sm:$0xff]   ;;  %v808_v11 = vld [vmem:[#allocation7] ss:$8 sps:$4 sm:$0xff]  }
  0x4e   :  { %v806_v10 = vld [vmem:[#allocation7 + $0x4] ss:$8 sps:$4 sm:$0xff]   ;;  %v809_v12 = vld [vmem:[#allocation7 + $0x14] ss:$8 sps:$4 sm:$0xff]   ;;  %v796_v13 = vld [vmem:[#allocation5 + $0x40] ss:$8 sps:$4 sm:$0xff]  }
  0x4f   :  { %440 = vmatprep.subr.bf16.mxu1 %v806_v10  ;;  %v811_v14 = vld [vmem:[#allocation7 + $0x10] ss:$8 sps:$4 sm:$0xff]   ;;  %v812_v15 = vld [vmem:[#allocation7 + $0x24] ss:$8 sps:$4 sm:$0xff]   ;;  %v797_v16 = vld [vmem:[#allocation5 + $0x54] ss:$8 sps:$4 sm:$0xff]  }
  0x50   :  { %194 = vmatpush1.bf16.msra.mxu0 %v787_v4  ;;  %441 = vmatpush1.bf16.msra.mxu1 %v808_v11  ;;  %v799_v17 = vld [vmem:[#allocation5 + $0x50] ss:$8 sps:$4 sm:$0xff]   ;;  %v814_v18 = vld [vmem:[#allocation7 + $0x20] ss:$8 sps:$4 sm:$0xff]   ;;  %v815_v19 = vld [vmem:[#allocation7 + $0x34] ss:$8 sps:$4 sm:$0xff]  }
  0x51   :  { %195 = vmatprep.subr.bf16.mxu0 %v788_v5  ;;  %442 = vmatprep.subr.bf16.mxu1 %v809_v12  ;;  %v800_v20 = vld [vmem:[#allocation5 + $0x64] ss:$8 sps:$4 sm:$0xff]   ;;  %v802_v21 = vld [vmem:[#allocation5 + $0x60] ss:$8 sps:$4 sm:$0xff]   ;;  %v817_v22 = vld [vmem:[#allocation7 + $0x30] ss:$8 sps:$4 sm:$0xff]  }
  0x52   :  { %v818_v23 = vld [vmem:[#allocation7 + $0x44] ss:$8 sps:$4 sm:$0xff]   ;;  %v803_v24 = vld [vmem:[#allocation5 + $0x74] ss:$8 sps:$4 sm:$0xff]   ;;  %v805_v25 = vld [vmem:[#allocation5 + $0x70] ss:$8 sps:$4 sm:$0xff]  }
  0x53   :  { %v820_v27 = vld [vmem:[#allocation7 + $0x40] ss:$8 sps:$4 sm:$0xff]   ;;  %v821_v28 = vld [vmem:[#allocation7 + $0x54] ss:$8 sps:$4 sm:$0xff]   ;;  %v823_v29 = vld [vmem:[#allocation7 + $0x50] ss:$8 sps:$4 sm:$0xff]  }
  0x54   :  { %196 = vmatpush1.bf16.msra.mxu0 %v790_v6  ;;  %443 = vmatpush1.bf16.msra.mxu1 %v811_v14  ;;  %v824_v30 = vld [vmem:[#allocation7 + $0x64] ss:$8 sps:$4 sm:$0xff]   ;;  %v826_v32 = vld [vmem:[#allocation7 + $0x60] ss:$8 sps:$4 sm:$0xff]   ;;  %v827_v33 = vld [vmem:[#allocation7 + $0x74] ss:$8 sps:$4 sm:$0xff]  }
  0x55   :  { %197 = vmatprep.subr.bf16.mxu0 %v791_v7  ;;  %444 = vmatprep.subr.bf16.mxu1 %v812_v15  ;;  %v829_v34 = vld [vmem:[#allocation7 + $0x70] ss:$8 sps:$4 sm:$0xff]   ;;  %v830_v35 = vld [vmem:[#allocation7 + $0x84] ss:$8 sps:$4 sm:$0xff]   ;;  %v832_v36 = vld [vmem:[#allocation7 + $0x80] ss:$8 sps:$4 sm:$0xff]  }
  0x56   :  { %v833_v37 = vld [vmem:[#allocation7 + $0x94] ss:$8 sps:$4 sm:$0xff]   ;;  %v835_v38 = vld [vmem:[#allocation7 + $0x90] ss:$8 sps:$4 sm:$0xff]   ;;  %v836_v39 = vld [vmem:[#allocation7 + $0xa4] ss:$8 sps:$4 sm:$0xff]  }
  0x57   :  { %v838_v40 = vld [vmem:[#allocation7 + $0xa0] ss:$8 sps:$4 sm:$0xff]   ;;  %v839_v41 = vld [vmem:[#allocation7 + $0xb4] ss:$8 sps:$4 sm:$0xff]   ;;  %v841_v42 = vld [vmem:[#allocation7 + $0xb0] ss:$8 sps:$4 sm:$0xff]  }
  0x58   :  { %198 = vmatpush1.bf16.msra.mxu0 %v793_v8  ;;  %445 = vmatpush1.bf16.msra.mxu1 %v814_v18  ;;  %v842_v43 = vld [vmem:[#allocation7 + $0xc4] ss:$8 sps:$4 sm:$0xff]   ;;  %v844_v44 = vld [vmem:[#allocation7 + $0xc0] ss:$8 sps:$4 sm:$0xff]   ;;  %v845_v45 = vld [vmem:[#allocation7 + $0xd4] ss:$8 sps:$4 sm:$0xff]  }
  0x59   :  { %199 = vmatprep.subr.bf16.mxu0 %v794_v9  ;;  %446 = vmatprep.subr.bf16.mxu1 %v815_v19  ;;  %v847_v46 = vld [vmem:[#allocation7 + $0xd0] ss:$8 sps:$4 sm:$0xff]   ;;  %v848_v47 = vld [vmem:[#allocation7 + $0xe4] ss:$8 sps:$4 sm:$0xff]   ;;  %v850_v48 = vld [vmem:[#allocation7 + $0xe0] ss:$8 sps:$4 sm:$0xff]  }
  0x5a   :  { %v851_v49 = vld [vmem:[#allocation7 + $0xf4] ss:$8 sps:$4 sm:$0xff]   ;;  %v853_v50 = vld [vmem:[#allocation7 + $0xf0] ss:$8 sps:$4 sm:$0xff]   ;;  %v854_v51 = vld [vmem:[#allocation8 + $0x40] sm:$0xff]   ;;  %v102_v0 = vshrl.u32 %v101_v63, 7 }
  0x5b   :  { %v855_v52 = vld [vmem:[#allocation8] sm:$0xff]   ;;  %v856_v53 = vld [vmem:[#allocation8 + $0x48] sm:$0xff]   ;;  %v858_v55 = vld [vmem:[#allocation8 + $0x50] sm:$0xff]  }
  0x5c   :  { %200 = vmatpush1.bf16.msra.mxu0 %v796_v13  ;;  %447 = vmatpush1.bf16.msra.mxu1 %v817_v22  ;;  %v857_v54 = vld [vmem:[#allocation8 + $0x8] sm:$0xff]   ;;  %v859_v56 = vld [vmem:[#allocation8 + $0x10] sm:$0xff]   ;;  %v860_v57 = vld [vmem:[#allocation8 + $0x58] sm:$0xff]   ;;  %v103_v1 = vsub.s32 0, %v102_v0  ;;  %v107_v3 = vsub.s32 1, %v102_v0 }
  0x5d   :  { %201 = vmatprep.subr.bf16.mxu0 %v797_v16  ;;  %448 = vmatprep.subr.bf16.mxu1 %v818_v23  ;;  %v861_v58 = vld [vmem:[#allocation8 + $0x18] sm:$0xff]   ;;  %v862_v59 = vld [vmem:[#allocation8 + $0x60] sm:$0xff]   ;;  %v864_v61 = vld [vmem:[#allocation8 + $0x68] sm:$0xff]  }
  0x5e   :  { %v863_v60 = vld [vmem:[#allocation8 + $0x20] sm:$0xff]   ;;  %v865_v62 = vld [vmem:[#allocation8 + $0x28] sm:$0xff]   ;;  %v99_v2 = vld [vmem:[%s1117_s2] sm:$0x3] }
  0x5f   :  { %v104_v4 = vrot.slane %v99_v2, %v103_v1  ;;  %v108_v5 = vrot.slane %v99_v2, %v107_v3  ;;  %v866_v16 = vld [vmem:[#allocation8 + $0x70] sm:$0xff]   ;;  %v868_v18 = vld [vmem:[#allocation8 + $0x78] sm:$0xff]  }
  0x60   :  { %202 = vmatpush1.bf16.msra.mxu0 %v799_v17  ;;  %449 = vmatpush1.bf16.msra.mxu1 %v820_v27  ;;  %v867_v17 = vld [vmem:[#allocation8 + $0x30] sm:$0xff]   ;;  %v869_v19 = vld [vmem:[#allocation8 + $0x38] sm:$0xff]  }
  0x61   :  { %203 = vmatprep.subr.bf16.mxu0 %v800_v20  ;;  %450 = vmatprep.subr.bf16.mxu1 %v821_v28  ;;  %v268_v20 = vld [vmem:[%s1119_s4] sm:$0x3]  ;;  %s999_s4 = smov [#allocation10]  }
  0x62   :  { %v277_v22 = vrot.slane %v268_v20, %v107_v3  ;;  %s674_s30 = sshll.u32 %s999_s4, 4  ;;  %s675_s30 = int_to_ptr.vmem [resolvable:$true] %s674_s30 }
  0x63   :  { %s960_s8 = scalar_lea.vmem %s675_s30, 128  ;;  %p965_p5 = scmp.lt.s32.totalorder %s675_s30, %s675_s30 }
  0x64   :  { %204 = vmatpush1.bf16.msra.mxu0 %v802_v21  ;;  %451 = vmatpush1.bf16.msra.mxu1 %v823_v29  ;;  %v273_v21 = vrot.slane %v268_v20, %v103_v1  ;;  %p961_p4 = scmp.ne.s32.totalorder %s675_s30, %s960_s8  ;;  %p966_p6 = scmp.lt.s32.totalorder %s960_s8, %s960_s8 }
  0x65   :  { %205 = vmatprep.subr.bf16.mxu0 %v803_v24  ;;  %452 = vmatprep.subr.bf16.mxu1 %v824_v30 }
  0x66   :  { %p967_p7 = por %p966_p6, %p965_p5 }
  0x68   :  { %206 = vmatpush1.bf16.msra.mxu0 %v805_v25  ;;  %453 = vmatpush1.bf16.msra.mxu1 %v826_v32  ;;  %p968_p8 = pnand %p967_p7, %p961_p4 }
  0x69   :  { %454 = vmatprep.subr.bf16.mxu1 %v827_v33  ;;  %750 = vmatprep.subr.bf16.mxu0 %v854_v51 }
  0x6b   :  { %224 = vmatmul.mubr.bf16.vlgmr.msra.gmra.mrb[0].mxu0 %v82_v31 }
  0x6c   :  { %455 = vmatpush1.bf16.msra.mxu1 %v829_v34  ;;  %751 = vmatpush3.bf16.msra.mxu0 %v855_v52  ;;  %v733_v34 = vld [vmem:[%s1121_s6] ss:$0 sm:$0xff] }
  0x6d   :  { %456 = vmatprep.subr.bf16.mxu1 %v830_v35  ;;  %752 = vmatprep.subr.bf16.mxu0 %v856_v53 }
  0x70   :  { %457 = vmatpush1.bf16.msra.mxu1 %v832_v36  ;;  %753 = vmatpush3.bf16.msra.mxu0 %v857_v54 }
  0x71   :  { %458 = vmatprep.subr.bf16.mxu1 %v833_v37  ;;  %754 = vmatprep.subr.bf16.mxu0 %v858_v55 }
  0x74   :  { %459 = vmatpush1.bf16.msra.mxu1 %v835_v38  ;;  %755 = vmatpush3.bf16.msra.mxu0 %v859_v56 }
  0x75   :  { %460 = vmatprep.subr.bf16.mxu1 %v836_v39  ;;  %756 = vmatprep.subr.bf16.mxu0 %v860_v57 }
  0x78   :  { %461 = vmatpush1.bf16.msra.mxu1 %v838_v40  ;;  %757 = vmatpush3.bf16.msra.mxu0 %v861_v58  ;;  %v664_v40 = vand.u32 127, %v101_v63 }
  0x79   :  { %462 = vmatprep.subr.bf16.mxu1 %v839_v41  ;;  %758 = vmatprep.subr.bf16.mxu0 %v862_v59 }
  0x7a   :  { %vm665_vm0 = vcmp.lt.s32.totalorder %v664_v40, 8 }
  0x7c   :  { %463 = vmatpush1.bf16.msra.mxu1 %v841_v42  ;;  %759 = vmatpush3.bf16.msra.mxu0 %v863_v60 }
  0x7d   :  { %464 = vmatprep.subr.bf16.mxu1 %v842_v43  ;;  %760 = vmatprep.subr.bf16.mxu0 %v864_v61 }
  0x80   :  { %465 = vmatpush1.bf16.msra.mxu1 %v844_v44  ;;  %761 = vmatpush3.bf16.msra.mxu0 %v865_v62 }
  0x81   :  { %466 = vmatprep.subr.bf16.mxu1 %v845_v45  ;;  %762 = vmatprep.subr.bf16.mxu0 %v866_v16 }
  0x84   :  { %467 = vmatpush1.bf16.msra.mxu1 %v847_v46  ;;  %763 = vmatpush3.bf16.msra.mxu0 %v867_v17 }
  0x85   :  { %468 = vmatprep.subr.bf16.mxu1 %v848_v47  ;;  %764 = vmatprep.subr.bf16.mxu0 %v868_v18 }
  0x88   :  { %469 = vmatpush1.bf16.msra.mxu1 %v850_v48  ;;  %765 = vmatpush3.bf16.msra.mxu0 %v869_v19 }
  0x89   :  { %470 = vmatprep.subr.bf16.mxu1 %v851_v49 }
  0x8c   :  { %471 = vmatpush1.bf16.msra.mxu1 %v853_v50 }
 0x13e   :  { %v225_v6 = vpop.f32.mrb[0].mxu0 }
 0x13f   :  { %v226_v7 = vadd.f32 %v225_v6, %v104_v4  ;;  %v227_v8 = vpop.f32.mrb[1].mxu0 }
 0x140   :  { %v228_v9 = vadd.f32 %v227_v8, %v108_v5  ;;  %v229_v10 = vpop.f32.mrb[2].mxu0 }
 0x141   :  { %v232_v11 = vmax.f32 %v226_v7, 0.0  ;;  %v230_v12 = vpop.f32.mrb[3].mxu0 }
 0x142   :  { %v233_v13 = vmax.f32 %v228_v9, 0.0 }
 0x143   :  { %v234_v15 = vpack.c.bf16 %v232_v11, %v232_v11 }
 0x144   :  { %v235_v14 = vpack.c.bf16 %v233_v13, %v233_v13 }
 0x146   :  { %472 = vmatprep.mubr.bf16.mxu1 %v235_v14 }
 0x147   :  { %473 = vmatmul.mubr.bf16.vlgmr.msra.gmra.mrb[0].mxu1 %v234_v15 }
 0x21a   :  { %v474_v23 = vpop.f32.mrb[0].mxu1 }
 0x21b   :  { %v475_v24 = vadd.f32 %v474_v23, %v273_v21  ;;  %v476_v25 = vpop.f32.mrb[1].mxu1 }
 0x21c   :  { %v477_v26 = vadd.f32 %v476_v25, %v277_v22  ;;  %v478_v27 = vpop.f32.mrb[2].mxu1 }
 0x21d   :  { %v481_v28 = vmax.f32 %v475_v24, 0.0  ;;  %v479_v29 = vpop.f32.mrb[3].mxu1 }
 0x21e   :  { %v482_v30 = vmax.f32 %v477_v26, 0.0 }
 0x21f   :  { %v483_v32 = vpack.c.bf16 %v481_v28, %v481_v28 }
 0x220   :  { %v484_v31 = vpack.c.bf16 %v482_v30, %v482_v30 }
 0x222   :  { %652 = vmatprep.mubr.bf16.mxu0 %v484_v31 }
 0x223   :  { %653 = vmatmul.mubr.bf16.vlgmr.msra.gmra.mrb[4].mxu0 %v483_v32 }
 0x2f6   :  { %v766_v33 = vpop.f32.mrb[4].mxu0 }
 0x2f7   :  { %v767_v35 = vpop.f32.mrb[5].mxu0 }
 0x2f8   :  { %v768_v36 = vadd.f32 %v767_v35, %v766_v33  ;;  %v769_v37 = vpop.f32.mrb[6].mxu0 }
 0x2f9   :  { %v770_v38 = vpop.f32.mrb[7].mxu0 }
 0x2fa   :  { %v655_v39 = vadd.f32 %v768_v36, %v733_v34 }
 0x2fc   :  { %870 = vtanh.f32 %v655_v39 }
 0x306   :  { %v871_v41 = vpop.eup %870 }
 0x307   :  { %v661_v42 = vmul.f32 3.5, %v871_v41 }
 0x309   :  { %v662_v43 = vadd.f32 -1.5, %v661_v42 }
 0x30b   :  { %v666_v44 = vsel %vm665_vm0, %v655_v39, %v662_v43 }
 0x30c   :  { %667 = vst [vmem:[#allocation10] sm:$0xff] %v666_v44 }
 0x30d   :  { %971 = shalt.err (!%p968_p8)
}
 0x30e   :  { %s972_s10 = scalar_lea.hbm %s1122_s7, 128 }
 0x30f   :  { %p973_p9 = scmp.ne.s32.totalorder %s1122_s7, %s972_s10  ;;  %p976_p10 = scmp.lt.u32.totalorder %s972_s10, %s1122_s7 }
 0x311   :  { %p978_p11 = pnand %p976_p10, %p973_p9 }
 0x313   :  { %981 = shalt.err (!%p978_p11)
}
 0x314   :  { %677 = dma.vmem_to_hbm [thread:$0]  %s675_s30, 128, %s1122_s7, [#allocation4]  }
 0x315   :  { %988 = dma.done.wait [#allocation4], 128  }
 0x316   :  { %989 = vsyncadd [#allocation4], 4294967168 }
 0x317   :  { %681 = vsyncpa [#allocation3], 1 }
 0x318   :  { %682 = vsyncpa [#allocation6], 1 }
 0x319   :  { %683 = vsyncpa [#allocation9], 1 }
 0x31a   :  { %684 = vsyncpa [#allocation4], 1 }

</bundles_post_ra>
